<compile_context>
chip_gen: v7x
topology: tpu7x:2x2x1
jax: 0.10.0
libtpu: 0.0.40
codegen_flags: <defaults>
</compile_context>

<pallas_src>
import jax
import jax.numpy as jnp
from jax.experimental import pallas as pl
from jax.experimental.pallas import tpu as pltpu

SELU_ALPHA = 1.6732632423543772
SELU_SCALE = 1.0507009873554805
LANES = 128  # fc1 output width == lane-dense slab width (module hard-codes 128)


def _selu(x):
    # Clamp the exp argument so the discarded branch never overflows.
    return SELU_SCALE * jnp.where(
        x > 0, x, SELU_ALPHA * (jnp.exp(jnp.minimum(x, 0.0)) - 1.0))


# --------------------------- Fused forward kernel ---------------------------
def gcn_fused_kernel(adj_ref, x_ref, w_ref, a_ref, slab_ref, o_ref, wide_ref):
    """Whole GCN forward for the batch; grid=() and all operands VMEM-resident.

    adj_ref : (B*N, B*N) bf16  block-diagonal adjacency
    x_ref   : (B*N, Fin) bf16  stacked node features
    w_ref   : (Fin, hid) bf16  gc1 weight
    a_ref   : (P*hid, 128) bf16  fc1 weight with 2x2 col-pool + BN scale folded in
    slab_ref: (B*P + 3 + B, 128) f32 packed small operands:
              rows [0 : BP)        row-pool matrix Pn (lanes [0:B*N]), rows (p, b)
              row  BP              gc1 bias (lanes [0:hid])
              row  BP+1            fc1 bias with BN shift folded in
              row  BP+2            fc2 weight row for the 128 l2 features
              rows [BP+3 : BP+3+B) wm*w_wm + fc2 bias, lane-broadcast
    o_ref   : (B, 128) f32 lane-dense output slab (column 0 is the prediction)
    wide_ref: (B, P*hid) f32 scratch for the sublane->lane flatten
    """
    BN = x_ref.shape[0]
    hid = w_ref.shape[1]
    B = o_ref.shape[0]
    N = BN // B
    P = N // 2
    BP = B * P

    pn = slab_ref[0:BP, 0:BN]                      # (BP, BN) row-pool matrix
    bias = slab_ref[BP:BP + 1, 0:hid]              # (1, hid)  gc1 bias
    b1 = slab_ref[BP + 1:BP + 2, :]                # (1, 128)  folded fc1 bias
    w2a = slab_ref[BP + 2:BP + 3, :]               # (1, 128)  fc2 l2-weights
    tail = slab_ref[BP + 3:BP + 3 + B, :]          # (B, 128)  wm*w_wm + b2

    # GraphConvolution for the whole batch, re-associated: (adj @ x) @ W + b,
    # then SELU.  (Dropout is eval-mode identity.)
    ax = jnp.dot(adj_ref[...], x_ref[...], preferred_element_type=jnp.float32)
    sup = jnp.dot(ax.astype(jnp.bfloat16), w_ref[...],
                  preferred_element_type=jnp.float32)              # (BN, hid)
    h = _selu(sup + bias)                                          # f32

    # Row half of AvgPool2d(2,2): one matmul with the 0.5-entry pooling matrix
    # (rows ordered p-major, batch-minor).  Column half is folded into a_ref.
    rp = jnp.dot(pn, h, preferred_element_type=jnp.float32)        # (BP, hid)

    # Flatten (p, b, j) -> (b, p*hid + j) through the VMEM scratch: P
    # contiguous (B, hid) sublane slices stored at lane offset p*hid.
    for p in range(P):
        wide_ref[:, p * hid:(p + 1) * hid] = rp[p * B:(p + 1) * B, :]

    # fc1 + SELU as ONE (B, P*hid) @ (P*hid, 128) matmul; the BN scale/shift
    # and the column pool are already folded into a_ref / b1.
    h1 = _selu(jnp.dot(wide_ref[...].astype(jnp.bfloat16), a_ref[...],
                       preferred_element_type=jnp.float32) + b1)   # (B, 128)

    # fc2: l2 part as VPU multiply + lane reduction (no N=1 MXU matmul); the
    # wm * w_wm + bias tail is pre-folded (lane-broadcast) into `tail`.
    out_col = jnp.sum(h1 * w2a, axis=-1, keepdims=True)            # (B, 1)
    o_ref[...] = out_col + tail                                    # one store


# -------------------------------- Wrapper --------------------------------
@jax.jit
def _gcn_core(x, adj, wm, params):
    B, N, Fin = x.shape
    hid = params["gc1_w"].shape[1]
    F1 = params["fc1_w"].shape[1]
    P, C = N // 2, hid // 2

    assert F1 == LANES and params["fc2_w_l2"].shape == (F1, 1)
    assert N % 2 == 0 and hid % 2 == 0
    assert hid <= LANES and B * N <= LANES  # small-graph kernel

    eps = 1e-5
    bn_scale = params["bn_gamma"] * jax.lax.rsqrt(params["bn_var"] + eps)   # (P*C,)
    bn_shift = params["bn_beta"] - params["bn_mean"] * bn_scale

    # Fold the BN shift into the fc1 bias: (l1*s + t)@W1 + b1 = (l1*s)@W1 + (t@W1 + b1).
    b1_eff = bn_shift[None, :] @ params["fc1_w"] + params["fc1_b"]          # (1, F1)

    # Fold the 2x2 column pool (0.5 per pair) and the BN scale into fc1_w:
    #   A[p*hid + j, k] = 0.5 * bn_scale[p, j//2] * W1[p*C + j//2, k]
    sw = bn_scale.reshape(P, C)[:, :, None] * params["fc1_w"].reshape(P, C, F1)
    a_fc1 = (0.5 * jnp.repeat(sw, 2, axis=1)).reshape(P * hid, F1)
    a_fc1 = a_fc1.astype(jnp.bfloat16)                                      # bf16 DMA

    # Block-diagonal adjacency + stacked features: batch folds into M.
    eye_b = jnp.eye(B, dtype=jnp.float32)
    adj_blk = (eye_b[:, None, :, None] * adj[:, :, None, :]).reshape(B * N, B * N)
    adj_blk = adj_blk.astype(jnp.bfloat16)
    x_stack = x.reshape(B * N, Fin).astype(jnp.bfloat16)
    w_bf = params["gc1_w"].astype(jnp.bfloat16)

    # Row-pool matrix, rows ordered (p-major, batch-minor): row p*B + b
    # averages nodes 2p and 2p+1 of graph b with weight 0.5 each.
    r = jnp.arange(B * P)[:, None]
    n = jnp.arange(B * N)[None, :]
    pn = jnp.where(((n // N) == (r % B)) & (((n % N) // 2) == (r // B)),
                   0.5, 0.0).astype(jnp.float32)

    # Pack every small f32 operand into one slab -> one DMA descriptor.
    pn_rows = jnp.zeros((B * P, LANES), jnp.float32).at[:, :B * N].set(pn)
    bias_row = jnp.zeros((1, LANES), jnp.float32).at[0, :hid].set(
        params["gc1_b"].reshape(-1))
    w2a_row = params["fc2_w_l2"].reshape(1, F1).astype(jnp.float32)
    tail = (wm @ params["fc2_w_wm"] + params["fc2_b"]).astype(jnp.float32)  # (B, 1)
    tail_rows = jnp.broadcast_to(tail, (B, LANES))
    slab = jnp.concatenate(
        [pn_rows, bias_row, b1_eff.astype(jnp.float32), w2a_row, tail_rows], axis=0)

    vmem = pltpu.MemorySpace.VMEM
    out = pl.pallas_call(
        gcn_fused_kernel,
        out_shape=jax.ShapeDtypeStruct((B, LANES), jnp.float32),
        in_specs=[pl.BlockSpec(memory_space=vmem) for _ in range(5)],
        out_specs=pl.BlockSpec(memory_space=vmem),
        scratch_shapes=[pltpu.VMEM((B, P * hid), jnp.float32)],
    )(adj_blk, x_stack, w_bf, a_fc1, slab)

    # Lane-dense output slab -> (B,) prediction (output_dim == 1).
    return out[:, 0]


def gcn_forward(x, adj, task, wm, params):
    # Task branch kept OUTSIDE the kernel so both tasks share one compiled
    # Mosaic kernel / executable; the sigmoid is a (B,)-sized op.
    pre = _gcn_core(x, adj, wm, params)
    if task == "sex_predict":
        return jax.nn.sigmoid(pre)
    elif task == "age_predict":
        return pre
    raise ValueError(f"unknown task: {task}")


# ------------------------- Pure-JAX f32 reference -------------------------
def gcn_reference(x, adj, task, wm, params):
    sup = jnp.einsum("bnf,fh->bnh", x, params["gc1_w"])
    g = jnp.einsum("bnm,bmh->bnh", adj, sup) + params["gc1_b"]
    h = jax.nn.selu(g)
    B, N, H = h.shape
    pooled = h.reshape(B, N // 2, 2, H // 2, 2).mean(axis=(2, 4))
    l1 = pooled.reshape(B, -1)
    l1 = ((l1 - params["bn_mean"]) / jnp.sqrt(params["bn_var"] + 1e-5)
          * params["bn_gamma"] + params["bn_beta"])
    l2 = jax.nn.selu(l1 @ params["fc1_w"] + params["fc1_b"])
    l2 = jnp.concatenate([l2, wm], axis=1)
    w2 = jnp.concatenate([params["fc2_w_l2"], params["fc2_w_wm"]], axis=0)
    out = (l2 @ w2 + params["fc2_b"]).reshape(B)
    return jax.nn.sigmoid(out) if task == "sex_predict" else out


def init_params(key, input_dim, hidden_dim, output_dim):
    # NOTE: the original module implicitly assumes node count N == input_dim
    # (flat pooled size = input_dim//2 * hidden_dim//2), which we follow.
    ks = jax.random.split(key, 6)
    flat = (input_dim // 2) * (hidden_dim // 2)
    return {
        "gc1_w": jax.random.normal(ks[0], (input_dim, hidden_dim), jnp.float32) * 0.1,
        "gc1_b": jax.random.normal(ks[1], (1, hidden_dim), jnp.float32) * 0.1,
        "bn_gamma": jnp.ones((flat,), jnp.float32),
        "bn_beta": jnp.zeros((flat,), jnp.float32),
        "bn_mean": jnp.zeros((flat,), jnp.float32),
        "bn_var": jnp.ones((flat,), jnp.float32),
        "fc1_w": jax.random.normal(ks[2], (flat, 128), jnp.float32) * 0.05,
        "fc1_b": jax.random.normal(ks[3], (1, 128), jnp.float32) * 0.05,
        "fc2_w_l2": jax.random.normal(ks[4], (128, output_dim), jnp.float32) * 0.05,
        "fc2_w_wm": jax.random.normal(ks[5], (1, output_dim), jnp.float32) * 0.05,
        "fc2_b": jnp.zeros((1, output_dim), jnp.float32),
    }


if __name__ == "__main__":
    B, input_dim, hidden_dim, output_dim = 2, 16, 32, 1

    key = jax.random.PRNGKey(0)
    kx, kadj, kwm, kp = jax.random.split(key, 4)

    x = jax.random.normal(kx, (B, input_dim, input_dim), jnp.float32)   # (B, N, F_in), N == F_in
    adj_raw = jax.random.uniform(kadj, (B, input_dim, input_dim), jnp.float32)
    adj = (adj_raw + jnp.swapaxes(adj_raw, 1, 2)) * 0.5                 # symmetric adjacency
    wm = jax.random.normal(kwm, (B, 1), jnp.float32)                    # extra covariate

    params = init_params(kp, input_dim, hidden_dim, output_dim)

    pred_sex = gcn_forward(x, adj, "sex_predict", wm, params)
    pred_age = gcn_forward(x, adj, "age_predict", wm, params)
    jax.block_until_ready(pred_sex)
    jax.block_until_ready(pred_age)

    assert pred_sex.shape == (B,) and pred_age.shape == (B,)
    assert bool(jnp.all(jnp.isfinite(pred_sex))) and bool(jnp.all(jnp.isfinite(pred_age)))

    # Loose correctness check against the f32 reference (kernel uses bf16 matmuls).
    ref_sex = gcn_reference(x, adj, "sex_predict", wm, params)
    ref_age = gcn_reference(x, adj, "age_predict", wm, params)
    err_sex = float(jnp.max(jnp.abs(pred_sex - ref_sex)))
    err_age = float(jnp.max(jnp.abs(pred_age - ref_age)))
    assert err_sex < 0.1 and err_age < 0.1, (err_sex, err_age)

    print("KERNEL_OK")
</pallas_src>

<mosaic_0001>
module attributes {stable_mosaic.version = 11 : i64} {
  func.func @gcn_fused_kernel(%arg0: memref<32x32xbf16, #tpu.memory_space<vmem>>, %arg1: memref<32x16xbf16, #tpu.memory_space<vmem>>, %arg2: memref<16x32xbf16, #tpu.memory_space<vmem>>, %arg3: memref<256x128xbf16, #tpu.memory_space<vmem>>, %arg4: memref<21x128xf32, #tpu.memory_space<vmem>>, %arg5: memref<2x128xf32, #tpu.memory_space<vmem>>, %arg6: memref<2x256xf32, #tpu.memory_space<vmem>>) attributes {dimension_semantics = [], scalar_prefetch = 0 : i64, scratch_operands = 1 : i64, tpu.core_type = #tpu.core_type<tc>} {
    %c0 = arith.constant 0 : index
    %c0_0 = arith.constant 0 : index
    %0 = vector.load %arg4[%c0, %c0_0] : memref<21x128xf32, #tpu.memory_space<vmem>>, vector<16x32xf32>
    %c16 = arith.constant 16 : index
    %c0_1 = arith.constant 0 : index
    %1 = vector.load %arg4[%c16, %c0_1] : memref<21x128xf32, #tpu.memory_space<vmem>>, vector<1x32xf32>
    %c17 = arith.constant 17 : index
    %c0_2 = arith.constant 0 : index
    %2 = vector.load %arg4[%c17, %c0_2] : memref<21x128xf32, #tpu.memory_space<vmem>>, vector<1x128xf32>
    %c18 = arith.constant 18 : index
    %c0_3 = arith.constant 0 : index
    %3 = vector.load %arg4[%c18, %c0_3] : memref<21x128xf32, #tpu.memory_space<vmem>>, vector<1x128xf32>
    %c19 = arith.constant 19 : index
    %c0_4 = arith.constant 0 : index
    %4 = vector.load %arg4[%c19, %c0_4] : memref<21x128xf32, #tpu.memory_space<vmem>>, vector<2x128xf32>
    %c0_5 = arith.constant 0 : index
    %c0_6 = arith.constant 0 : index
    %5 = vector.load %arg0[%c0_5, %c0_6] : memref<32x32xbf16, #tpu.memory_space<vmem>>, vector<32x32xbf16>
    %c0_7 = arith.constant 0 : index
    %c0_8 = arith.constant 0 : index
    %6 = vector.load %arg1[%c0_7, %c0_8] : memref<32x16xbf16, #tpu.memory_space<vmem>>, vector<32x16xbf16>
    %cst = arith.constant dense<0.000000e+00> : vector<32x16xf32>
    %7 = tpu.matmul %5, %6, %cst {dimension_numbers = #tpu.dot_dimension_numbers<[1], [0], [0], [1], [0, 0, 1, 1], [], []>} : vector<32x32xbf16>, vector<32x16xbf16>, vector<32x16xf32> -> vector<32x16xf32>
    %8 = arith.truncf %7 : vector<32x16xf32> to vector<32x16xbf16>
    %c0_9 = arith.constant 0 : index
    %c0_10 = arith.constant 0 : index
    %9 = vector.load %arg2[%c0_9, %c0_10] : memref<16x32xbf16, #tpu.memory_space<vmem>>, vector<16x32xbf16>
    %cst_11 = arith.constant dense<0.000000e+00> : vector<32x32xf32>
    %10 = tpu.matmul %8, %9, %cst_11 {dimension_numbers = #tpu.dot_dimension_numbers<[1], [0], [0], [1], [0, 0, 1, 1], [], []>} : vector<32x16xbf16>, vector<16x32xbf16>, vector<32x32xf32> -> vector<32x32xf32>
    %11 = vector.broadcast %1 : vector<1x32xf32> to vector<32x32xf32>
    %12 = arith.addf %10, %11 : vector<32x32xf32>
    %cst_12 = arith.constant 0.000000e+00 : f32
    %13 = vector.broadcast %cst_12 : f32 to vector<32x32xf32>
    %14 = arith.cmpf ogt, %12, %13 : vector<32x32xf32>
    %cst_13 = arith.constant 0.000000e+00 : f32
    %15 = vector.broadcast %cst_13 : f32 to vector<32x32xf32>
    %16 = arith.minimumf %12, %15 : vector<32x32xf32>
    %17 = math.exp %16 : vector<32x32xf32>
    %cst_14 = arith.constant 1.000000e+00 : f32
    %18 = vector.broadcast %cst_14 : f32 to vector<32x32xf32>
    %19 = arith.subf %17, %18 : vector<32x32xf32>
    %cst_15 = arith.constant 1.67326319 : f32
    %20 = vector.broadcast %cst_15 : f32 to vector<32x32xf32>
    %21 = arith.mulf %20, %19 : vector<32x32xf32>
    %22 = arith.select %14, %12, %21 : vector<32x32xi1>, vector<32x32xf32>
    %cst_16 = arith.constant 1.05070102 : f32
    %23 = vector.broadcast %cst_16 : f32 to vector<32x32xf32>
    %24 = arith.mulf %23, %22 : vector<32x32xf32>
    %cst_17 = arith.constant dense<0.000000e+00> : vector<16x32xf32>
    %25 = tpu.matmul %0, %24, %cst_17 {dimension_numbers = #tpu.dot_dimension_numbers<[1], [0], [0], [1], [0, 0, 1, 1], [], []>} : vector<16x32xf32>, vector<32x32xf32>, vector<16x32xf32> -> vector<16x32xf32>
    %26 = vector.extract_strided_slice %25 {offsets = [0, 0], sizes = [2, 32], strides = [1, 1]} : vector<16x32xf32> to vector<2x32xf32>
    %c0_18 = arith.constant 0 : index
    %c0_19 = arith.constant 0 : index
    %27 = vector.load %arg6[%c0_18, %c0_19] : memref<2x256xf32, #tpu.memory_space<vmem>>, vector<2x32xf32>
    tpu.vector_store %arg6[%c0_18, %c0_19], %26 {strides = array<i32>} : memref<2x256xf32, #tpu.memory_space<vmem>>, vector<2x32xf32>,
    %28 = vector.extract_strided_slice %25 {offsets = [2, 0], sizes = [2, 32], strides = [1, 1]} : vector<16x32xf32> to vector<2x32xf32>
    %c0_20 = arith.constant 0 : index
    %c32 = arith.constant 32 : index
    %29 = vector.load %arg6[%c0_20, %c32] : memref<2x256xf32, #tpu.memory_space<vmem>>, vector<2x32xf32>
    tpu.vector_store %arg6[%c0_20, %c32], %28 {strides = array<i32>} : memref<2x256xf32, #tpu.memory_space<vmem>>, vector<2x32xf32>,
    %30 = vector.extract_strided_slice %25 {offsets = [4, 0], sizes = [2, 32], strides = [1, 1]} : vector<16x32xf32> to vector<2x32xf32>
    %c0_21 = arith.constant 0 : index
    %c64 = arith.constant 64 : index
    %31 = vector.load %arg6[%c0_21, %c64] : memref<2x256xf32, #tpu.memory_space<vmem>>, vector<2x32xf32>
    tpu.vector_store %arg6[%c0_21, %c64], %30 {strides = array<i32>} : memref<2x256xf32, #tpu.memory_space<vmem>>, vector<2x32xf32>,
    %32 = vector.extract_strided_slice %25 {offsets = [6, 0], sizes = [2, 32], strides = [1, 1]} : vector<16x32xf32> to vector<2x32xf32>
    %c0_22 = arith.constant 0 : index
    %c96 = arith.constant 96 : index
    %33 = vector.load %arg6[%c0_22, %c96] : memref<2x256xf32, #tpu.memory_space<vmem>>, vector<2x32xf32>
    tpu.vector_store %arg6[%c0_22, %c96], %32 {strides = array<i32>} : memref<2x256xf32, #tpu.memory_space<vmem>>, vector<2x32xf32>,
    %34 = vector.extract_strided_slice %25 {offsets = [8, 0], sizes = [2, 32], strides = [1, 1]} : vector<16x32xf32> to vector<2x32xf32>
    %c0_23 = arith.constant 0 : index
    %c128 = arith.constant 128 : index
    %35 = vector.load %arg6[%c0_23, %c128] : memref<2x256xf32, #tpu.memory_space<vmem>>, vector<2x32xf32>
    tpu.vector_store %arg6[%c0_23, %c128], %34 {strides = array<i32>} : memref<2x256xf32, #tpu.memory_space<vmem>>, vector<2x32xf32>,
    %36 = vector.extract_strided_slice %25 {offsets = [10, 0], sizes = [2, 32], strides = [1, 1]} : vector<16x32xf32> to vector<2x32xf32>
    %c0_24 = arith.constant 0 : index
    %c160 = arith.constant 160 : index
    %37 = vector.load %arg6[%c0_24, %c160] : memref<2x256xf32, #tpu.memory_space<vmem>>, vector<2x32xf32>
    tpu.vector_store %arg6[%c0_24, %c160], %36 {strides = array<i32>} : memref<2x256xf32, #tpu.memory_space<vmem>>, vector<2x32xf32>,
    %38 = vector.extract_strided_slice %25 {offsets = [12, 0], sizes = [2, 32], strides = [1, 1]} : vector<16x32xf32> to vector<2x32xf32>
    %c0_25 = arith.constant 0 : index
    %c192 = arith.constant 192 : index
    %39 = vector.load %arg6[%c0_25, %c192] : memref<2x256xf32, #tpu.memory_space<vmem>>, vector<2x32xf32>
    tpu.vector_store %arg6[%c0_25, %c192], %38 {strides = array<i32>} : memref<2x256xf32, #tpu.memory_space<vmem>>, vector<2x32xf32>,
    %40 = vector.extract_strided_slice %25 {offsets = [14, 0], sizes = [2, 32], strides = [1, 1]} : vector<16x32xf32> to vector<2x32xf32>
    %c0_26 = arith.constant 0 : index
    %c224 = arith.constant 224 : index
    %41 = vector.load %arg6[%c0_26, %c224] : memref<2x256xf32, #tpu.memory_space<vmem>>, vector<2x32xf32>
    tpu.vector_store %arg6[%c0_26, %c224], %40 {strides = array<i32>} : memref<2x256xf32, #tpu.memory_space<vmem>>, vector<2x32xf32>,
    %c0_27 = arith.constant 0 : index
    %c0_28 = arith.constant 0 : index
    %42 = vector.load %arg6[%c0_27, %c0_28] : memref<2x256xf32, #tpu.memory_space<vmem>>, vector<2x256xf32>
    %43 = arith.truncf %42 : vector<2x256xf32> to vector<2x256xbf16>
    %c0_29 = arith.constant 0 : index
    %c0_30 = arith.constant 0 : index
    %44 = vector.load %arg3[%c0_29, %c0_30] : memref<256x128xbf16, #tpu.memory_space<vmem>>, vector<256x128xbf16>
    %cst_31 = arith.constant dense<0.000000e+00> : vector<2x128xf32>
    %45 = tpu.matmul %43, %44, %cst_31 {dimension_numbers = #tpu.dot_dimension_numbers<[1], [0], [0], [1], [0, 0, 1, 1], [], []>} : vector<2x256xbf16>, vector<256x128xbf16>, vector<2x128xf32> -> vector<2x128xf32>
    %46 = vector.broadcast %2 : vector<1x128xf32> to vector<2x128xf32>
    %47 = arith.addf %45, %46 : vector<2x128xf32>
    %cst_32 = arith.constant 0.000000e+00 : f32
    %48 = vector.broadcast %cst_32 : f32 to vector<2x128xf32>
    %49 = arith.cmpf ogt, %47, %48 : vector<2x128xf32>
    %cst_33 = arith.constant 0.000000e+00 : f32
    %50 = vector.broadcast %cst_33 : f32 to vector<2x128xf32>
    %51 = arith.minimumf %47, %50 : vector<2x128xf32>
    %52 = math.exp %51 : vector<2x128xf32>
    %cst_34 = arith.constant 1.000000e+00 : f32
    %53 = vector.broadcast %cst_34 : f32 to vector<2x128xf32>
    %54 = arith.subf %52, %53 : vector<2x128xf32>
    %cst_35 = arith.constant 1.67326319 : f32
    %55 = vector.broadcast %cst_35 : f32 to vector<2x128xf32>
    %56 = arith.mulf %55, %54 : vector<2x128xf32>
    %57 = arith.select %49, %47, %56 : vector<2x128xi1>, vector<2x128xf32>
    %cst_36 = arith.constant 1.05070102 : f32
    %58 = vector.broadcast %cst_36 : f32 to vector<2x128xf32>
    %59 = arith.mulf %58, %57 : vector<2x128xf32>
    %60 = vector.broadcast %3 : vector<1x128xf32> to vector<2x128xf32>
    %61 = arith.mulf %59, %60 : vector<2x128xf32>
    %cst_37 = arith.constant dense<0.000000e+00> : vector<2xf32>
    %62 = vector.multi_reduction <add>, %61, %cst_37 [1] : vector<2x128xf32> to vector<2xf32>
    %63 = vector.shape_cast %62 : vector<2xf32> to vector<2x1xf32>
    %64 = vector.broadcast %63 : vector<2x1xf32> to vector<2x128xf32>
    %65 = arith.addf %64, %4 : vector<2x128xf32>
    %c0_38 = arith.constant 0 : index
    %c0_39 = arith.constant 0 : index
    %66 = vector.load %arg5[%c0_38, %c0_39] : memref<2x128xf32, #tpu.memory_space<vmem>>, vector<2x128xf32>
    tpu.vector_store %arg5[%c0_38, %c0_39], %65 {strides = array<i32>} : memref<2x128xf32, #tpu.memory_space<vmem>>, vector<2x128xf32>,
    return
  }
}

</mosaic_0001>

<bundles_post_ra>
// kernel: mul.19
= control target key start
LH: loop header
LB: loop body
LE: loop exit
PB: predicated region body
PF: predicated region fallthrough
CT: control target
= control target key end

     0   :  { %s66_s8 = smov 80   ;;  %vm7_vm0 = vcmask 130048   ;;  %s67_s11 = smov 96   ;;  %s117_s0 = inlined_call_operand.vmem [shape: f32[128], index: 0, kind: input, shape index: {}]   ;;  %s118_s1 = inlined_call_operand.vmem [shape: f32[8,16], index: 1, kind: output, shape index: {}]  }
   0x1   :  { %v4_v0 = vld [vmem:[%s117_s0] sm:$0x1]  ;;  %s65_s0 = smov 112   ;;  %s68_s12 = smov 64  }
   0x2   :  { %5 = vst [vmem:[#allocation0] sm:$0x1] %v4_v0  ;;  %s69_s13 = smov 48   ;;  %s70_s14 = smov 32  }
   0x3   :  { %s71_s15 = smov 16  }
   0x9   :  { %v9_v1 = vld [vmem:[#allocation0] sm:$0x1]  }
   0xa   :  { %v21_v2 = vld [vmem:[#allocation0] sm:$0x1]   ;;  %10 = vrot.lane.b32.xlu0 %v9_v1, %s65_s0 }
   0xb   :  { %22 = vrot.lane.b32.xlu1 %v21_v2, %s66_s8  ;;  %v15_v3 = vld [vmem:[#allocation0] sm:$0x1]  }
   0xc   :  { %v27_v4 = vld [vmem:[#allocation0] sm:$0x1]  }
   0xd   :  { %v6_v5 = vld [vmem:[#allocation0] sm:$0x1]  }
   0xe   :  { %8 = vst.msk [vmem:[%s118_s1] sm:$0x1] %vm7_vm0, %v6_v5   ;;  %16 = vrot.lane.b32.xlu0 %v15_v3, %s67_s11  ;;  %v33_v6 = vld [vmem:[#allocation0] sm:$0x1]  }
   0xf   :  { %28 = vrot.lane.b32.xlu1 %v27_v4, %s68_s12  ;;  %v39_v7 = vld [vmem:[#allocation0] sm:$0x1]  }
  0x10   :  { %v45_v8 = vld [vmem:[#allocation0] sm:$0x1]  }
  0x12   :  { %34 = vrot.lane.b32.xlu0 %v33_v6, %s69_s13 }
  0x13   :  { %40 = vrot.lane.b32.xlu1 %v39_v7, %s70_s14 }
  0x16   :  { %46 = vrot.lane.b32.xlu0 %v45_v8, %s71_s15 }
  0x7c   :  { %v11_v9 = vpop.permute.xlu0 %10  }
  0x7d   :  { %v23_v10 = vpop.permute.xlu1 %22   ;;  %51 = vst.msk [vmem:[%s118_s1 + $0x1] sm:$0x1] %vm7_vm0, %v11_v9  }
  0x7e   :  { %53 = vst.msk [vmem:[%s118_s1 + $0x3] sm:$0x1] %vm7_vm0, %v23_v10  }
  0x80   :  { %v17_v11 = vpop.permute.xlu0 %16  }
  0x81   :  { %v29_v12 = vpop.permute.xlu1 %28   ;;  %52 = vst.msk [vmem:[%s118_s1 + $0x2] sm:$0x1] %vm7_vm0, %v17_v11  }
  0x82   :  { %54 = vst.msk [vmem:[%s118_s1 + $0x4] sm:$0x1] %vm7_vm0, %v29_v12  }
  0x84   :  { %v35_v13 = vpop.permute.xlu0 %34  }
  0x85   :  { %v41_v14 = vpop.permute.xlu1 %40   ;;  %55 = vst.msk [vmem:[%s118_s1 + $0x5] sm:$0x1] %vm7_vm0, %v35_v13  }
  0x86   :  { %56 = vst.msk [vmem:[%s118_s1 + $0x6] sm:$0x1] %vm7_vm0, %v41_v14  }
  0x88   :  { %v47_v15 = vpop.permute.xlu0 %46  }
  0x89   :  { %57 = vst.msk [vmem:[%s118_s1 + $0x7] sm:$0x1] %vm7_vm0, %v47_v15  }

// kernel: _gcn_core.1
= control target key start
LH: loop header
LB: loop body
LE: loop exit
PB: predicated region body
PF: predicated region fallthrough
CT: control target
= control target key end

     0   :  { %vm57_vm0 = vcmask 261120   ;;  %vm127_vm1 = vcmask 130048   ;;  %v710_v58 = vmov 1983009808   ;;  %v302_v60 = vlaneseq  ;;  %s711_s8 = smov 64   ;;  %s712_s9 = smov 32   ;;  %s832_s1 = inlined_call_operand.vmem [shape: bf16[32,16], index: 1, kind: input, shape index: {}]   ;;  %s833_s0 = inlined_call_operand.vmem [shape: bf16[32,32], index: 0, kind: input, shape index: {}]   ;;  %s834_s2 = inlined_call_operand.vmem [shape: bf16[16,32], index: 2, kind: input, shape index: {}]   ;;  %s835_s4 = inlined_call_operand.vmem [shape: f32[21,128], index: 4, kind: input, shape index: {}]   ;;  %s836_s3 = inlined_call_operand.vmem [shape: bf16[256,128], index: 3, kind: input, shape index: {}]   ;;  %s837_s5 = inlined_call_operand.vmem [shape: f32[2,128], index: 5, kind: output, shape index: {}]  }
   0x1   :  { %v679_v0 = vld [vmem:[%s832_s1] sm:$0xff]   ;;  %v680_v1 = vld [vmem:[%s832_s1 + $0x8] sm:$0xff]   ;;  %v577_v12 = vld [vmem:[%s835_s4 + $0x10] ss:$0 sm:$0xff]  ;;  %v300_v59 = vunpack.c.l.s4 %v710_v58  ;;  %vm296_vm6 = vcmask 254976   ;;  %s713_s12 = smov 96  }
   0x2   :  { %642 = vmatprep.subr.bf16.mxu1 %v679_v0  ;;  %v681_v2 = vld [vmem:[%s833_s0] sm:$0xff]   ;;  %v682_v4 = vld [vmem:[%s833_s0 + $0x8] sm:$0xff]   ;;  %v688_v56 = vld [vmem:[%s836_s3 + $0x50] sm:$0xff]   ;;  %vm310_vm7 = vcmask 517376   ;;  %vm323_vm8 = vcmask 779776   ;;  %vm329_vm9 = vcmask 1042176  }
   0x3   :  { %643 = vmatpush3.bf16.msra.mxu1 %v679_v0  ;;  %646 = vmatprep.mubr.msk.bf16.mxu1 %vm57_vm0, %v681_v2  ;;  %v683_v3 = vld [vmem:[%s834_s2] sm:$0xff]   ;;  %v22_v51 = vld [vmem:[%s835_s4 + $0x8] sm:$0xff]  ;;  %v689_v57 = vld [vmem:[%s836_s3 + $0x10] sm:$0xff]   ;;  %v301_v63 = vunpack.c.0.s8 %v300_v59  ;;  %v303_v0 = vshrl.u32 %v302_v60, 7  ;;  %vm561_vm11 = vcmask 1041408  }
   0x4   :  { %644 = vmatprep.subr.bf16.mxu1 %v680_v1  ;;  %v21_v11 = vld [vmem:[%s835_s4] sm:$0xff]  ;;  %v686_v54 = vld [vmem:[%s836_s3 + $0x48] sm:$0xff]   ;;  %v690_v61 = vld [vmem:[%s836_s3 + $0x58] sm:$0xff]  }
   0x5   :  { %v684_v52 = vld [vmem:[%s836_s3 + $0x40] sm:$0xff]   ;;  %v687_v55 = vld [vmem:[%s836_s3 + $0x8] sm:$0xff]   ;;  %v691_v62 = vld [vmem:[%s836_s3 + $0x18] sm:$0xff]  }
   0x6   :  { %v685_v53 = vld [vmem:[%s836_s3] sm:$0xff]   ;;  %620 = vmatprep.subr.bf16.mxu0 %v684_v52 }
   0x7   :  { %645 = vmatpush3.bf16.msra.mxu1 %v680_v1  ;;  %621 = vmatpush3.bf16.msra.mxu0 %v685_v53  ;;  %v692_v1 = vld [vmem:[%s836_s3 + $0x60] sm:$0xff]  }
   0x8   :  { %650 = vmatprep.subr.bf16.mxu1 %v683_v3  ;;  %622 = vmatprep.subr.bf16.mxu0 %v686_v54  ;;  %v693_v2 = vld [vmem:[%s836_s3 + $0x20] sm:$0xff]  }
   0xa   :  { %647 = vmatmul.mubr.msk.bf16.vlgmr.msra.gmra.mrb[0].mxu1 %vm57_vm0, %v682_v4  ;;  %v694_v4 = vld [vmem:[%s836_s3 + $0x68] sm:$0xff]  }
   0xb   :  { %651 = vmatpush3.bf16.msra.mxu1 %v683_v3  ;;  %623 = vmatpush3.bf16.msra.mxu0 %v687_v55  ;;  %v304_v3 = vsub.s32 %v301_v63, %v303_v0 }
   0xc   :  { %624 = vmatprep.subr.bf16.mxu0 %v688_v56 }
   0xf   :  { %625 = vmatpush3.bf16.msra.mxu0 %v689_v57 }
  0x10   :  { %626 = vmatprep.subr.bf16.mxu0 %v690_v61 }
  0x13   :  { %627 = vmatpush3.bf16.msra.mxu0 %v691_v62 }
  0x14   :  { %628 = vmatprep.subr.bf16.mxu0 %v692_v1 }
  0x17   :  { %629 = vmatpush3.bf16.msra.mxu0 %v693_v2 }
  0x18   :  { %630 = vmatprep.subr.bf16.mxu0 %v694_v4 }
  0xdd   :  { %v648_v5 = vpop.f32.mrb[0].mxu1 }
  0xde   :  { %v98_v6 = vpop.f32.mrb[1].mxu1 }
  0xdf   :  { %v649_v7 = vpop.f32.mrb[2].mxu1 }
  0xe0   :  { %v114_v8 = vpack.c.bf16 %v649_v7, %v648_v5  ;;  %v101_v9 = vpop.f32.mrb[3].mxu1  ;;  %v696_v7 = vld [vmem:[%s836_s3 + $0x70] sm:$0xff]  }
  0xe1   :  { %v113_v10 = vpack.c.bf16 %v101_v9, %v98_v6  ;;  %v695_v6 = vld [vmem:[%s836_s3 + $0x28] sm:$0xff]  }
  0xe2   :  { %631 = vmatpush3.bf16.msra.mxu0 %v695_v6 }
  0xe3   :  { %652 = vmatprep.mubr.msk.bf16.mxu1 %vm127_vm1, %v113_v10  ;;  %632 = vmatprep.subr.bf16.mxu0 %v696_v7 }
  0xe4   :  { %653 = vmatmul.mubr.msk.bf16.vlgmr.msra.gmra.mrb[4].mxu1 %vm127_vm1, %v114_v8 }
  0xe5   :  { %664 = vmatprep.mubr.msk.f32.mxu1 %vm57_vm0, %v21_v11  ;;  %v697_v11 = vld [vmem:[%s836_s3 + $0x30] sm:$0xff]  }
  0xe6   :  { %633 = vmatpush3.bf16.msra.mxu0 %v697_v11 }
 0x1b7   :  { %v654_v13 = vpop.f32.mrb[4].mxu1 }
 0x1b8   :  { %v177_v14 = vadd.f32 %v654_v13, %v577_v12  ;;  %v168_v15 = vpop.f32.mrb[5].mxu1 }
 0x1b9   :  { %v169_v16 = vadd.f32 %v577_v12, %v168_v15  ;;  %v655_v17 = vpop.f32.mrb[6].mxu1 }
 0x1ba   :  { %v189_v18 = vmin.f32 %v177_v14, 0.0  ;;  %v180_v19 = vadd.f32 %v655_v17, %v577_v12  ;;  %v171_v20 = vpop.f32.mrb[7].mxu1  ;;  %vm185_vm2 = vcmp.gt.f32.partialorder %v177_v14, 0.0  ;;  %v699_v17 = vld [vmem:[%s836_s3 + $0x38] sm:$0xff]  }
 0x1bb   :  { %v187_v21 = vmin.f32 %v169_v16, 0.0  ;;  %v172_v22 = vadd.f32 %v577_v12, %v171_v20  ;;  %vm183_vm3 = vcmp.gt.f32.partialorder %v169_v16, 0.0 }
 0x1bc   :  { %v195_v23 = vmul.f32 1.442695, %v189_v18  ;;  %v190_v24 = vmin.f32 %v180_v19, 0.0  ;;  %vm186_vm4 = vcmp.gt.f32.partialorder %v180_v19, 0.0 }
 0x1bd   :  { %v191_v25 = vmul.f32 1.442695, %v187_v21  ;;  %v188_v26 = vmin.f32 %v172_v22, 0.0  ;;  %vm184_vm5 = vcmp.gt.f32.partialorder %v172_v22, 0.0 }
 0x1be   :  { %700 = vpow2.f32 %v195_v23  ;;  %v197_v27 = vmul.f32 1.442695, %v190_v24 }
 0x1bf   :  { %702 = vpow2.f32 %v191_v25  ;;  %v193_v28 = vmul.f32 1.442695, %v188_v26 }
 0x1c0   :  { %704 = vpow2.f32 %v197_v27 }
 0x1c1   :  { %706 = vpow2.f32 %v193_v28 }
 0x1c8   :  { %v701_v29 = vpop.eup %700 }
 0x1c9   :  { %v703_v30 = vpop.eup %702  ;;  %v583_v31 = vadd.f32 -1.0, %v701_v29 }
 0x1ca   :  { %v705_v32 = vpop.eup %704  ;;  %v581_v33 = vadd.f32 -1.0, %v703_v30 }
 0x1cb   :  { %v707_v34 = vpop.eup %706  ;;  %v205_v35 = vmul.f32 1.6732632, %v583_v31  ;;  %v584_v36 = vadd.f32 -1.0, %v705_v32 }
 0x1cc   :  { %v203_v37 = vmul.f32 1.6732632, %v581_v33  ;;  %v582_v38 = vadd.f32 -1.0, %v707_v34  ;;  %v588_v33 = vld [vmem:[%s835_s4 + $0x11] ss:$0 sm:$0xff] }
 0x1cd   :  { %v209_v39 = vsel %vm185_vm2, %v177_v14, %v205_v35  ;;  %v206_v40 = vmul.f32 1.6732632, %v584_v36 }
 0x1ce   :  { %v207_v41 = vsel %vm183_vm3, %v169_v16, %v203_v37  ;;  %v204_v42 = vmul.f32 1.6732632, %v582_v38  ;;  %v213_v44 = vmul.f32 1.050701, %v209_v39  ;;  %v698_v16 = vld [vmem:[%s836_s3 + $0x78] sm:$0xff]  }
 0x1cf   :  { %v210_v43 = vsel %vm186_vm4, %v180_v19, %v206_v40  ;;  %v211_v47 = vmul.f32 1.050701, %v207_v41  ;;  %634 = vmatprep.subr.bf16.mxu0 %v698_v16 }
 0x1d0   :  { %v214_v45 = vmul.f32 1.050701, %v210_v43  ;;  %v208_v46 = vsel %vm184_vm5, %v172_v22, %v204_v42  ;;  %635 = vmatpush3.bf16.msra.mxu0 %v699_v17 }
 0x1d1   :  { %v212_v48 = vmul.f32 1.050701, %v208_v46 }
 0x1d2   :  { %v671_v49 = vpack.c.bf16 %v214_v45, %v213_v44  ;;  %v606_v44 = vld [vmem:[%s835_s4 + $0x12] ss:$0 sm:$0xff] }
 0x1d3   :  { %v667_v50 = vpack.c.bf16 %v212_v48, %v211_v47 }
 0x1d5   :  { %668 = vmatprep.subr.bf16.mxu1 %v667_v50 }
 0x1d6   :  { %670 = vmatpush3.bf16.msra.mxu1 %v667_v50 }
 0x1d7   :  { %672 = vmatprep.subr.bf16.mxu1 %v671_v49 }
 0x1da   :  { %674 = vmatpush3.bf16.msra.mxu1 %v671_v49  ;;  %v26_v49 = vld [vmem:[%s835_s4 + $0x13] sm:$0x3] }
 0x1dd   :  { %665 = vmatmul.mubr.msk.f32.vlgmr.msra.gmra.mrb[8].mxu1 %vm57_vm0, %v22_v51 }
 0x2b0   :  { %v666_v5 = vpop.f32.mrb[8].mxu1 }
 0x2b1   :  { %v287_v8 = vpop.f32.mrb[9].mxu1  ;;  %331 = vst.msk [vmem:[#allocation2 + $0x2] sm:$0x3] %vm296_vm6, %v666_v5  ;;  %v345_v9 = vcombine.high %v666_v5, %v666_v5  ;;  %v339_v10 = vrot.slane %v666_v5, %v304_v3 }
 0x2b2   :  { %297 = vst.msk [vmem:[#allocation2] sm:$0x3] %vm296_vm6, %v287_v8  ;;  %v305_v12 = vrot.slane %v287_v8, %v304_v3  ;;  %v312_v13 = vcombine.high %v287_v8, %v287_v8 }
 0x2b3   :  { %v352_v14 = vrot.slane %v345_v9, %v304_v3  ;;  %v340_v15 = vcombine.high %v339_v10, %v339_v10 }
 0x2b4   :  { %v306_v18 = vcombine.high %v305_v12, %v305_v12  ;;  %v319_v19 = vrot.slane %v312_v13, %v304_v3 }
 0x2b5   :  { %353 = vrot.lane.b32.xlu1 %v352_v14, %s711_s8  ;;  %341 = vrot.lane.b32.xlu0 %v340_v15, %s712_s9  ;;  %v357_v20 = vcombine.high %v352_v14, %v352_v14 }
 0x2b6   :  { %v325_v21 = vcombine.high %v319_v19, %v319_v19 }
 0x2b9   :  { %320 = vrot.lane.b32.xlu1 %v319_v19, %s711_s8  ;;  %307 = vrot.lane.b32.xlu0 %v306_v18, %s712_s9 }
 0x2bd   :  { %358 = vrot.lane.b32.xlu1 %v357_v20, %s713_s12  ;;  %326 = vrot.lane.b32.xlu0 %v325_v21, %s713_s12 }
 0x327   :  { %v354_v22 = vpop.permute.xlu1 %353  ;;  %v342_v23 = vpop.permute.xlu0 %341 }
 0x328   :  { %344 = vst.msk [vmem:[#allocation2 + $0x2] sm:$0x3] %vm310_vm7, %v342_v23 }
 0x329   :  { %356 = vst.msk [vmem:[#allocation2 + $0x2] sm:$0x3] %vm323_vm8, %v354_v22 }
 0x32b   :  { %v321_v24 = vpop.permute.xlu1 %320  ;;  %v308_v25 = vpop.permute.xlu0 %307 }
 0x32c   :  { %311 = vst.msk [vmem:[#allocation2] sm:$0x3] %vm310_vm7, %v308_v25 }
 0x32d   :  { %324 = vst.msk [vmem:[#allocation2] sm:$0x3] %vm323_vm8, %v321_v24 }
 0x32f   :  { %v359_v26 = vpop.permute.xlu1 %358  ;;  %v327_v27 = vpop.permute.xlu0 %326 }
 0x330   :  { %361 = vst.msk [vmem:[#allocation2 + $0x2] sm:$0x3] %vm329_vm9, %v359_v26  ;;  %330 = vst.msk [vmem:[#allocation2] sm:$0x3] %vm329_vm9, %v327_v27 }
 0x337   :  { %v587_v28 = vld.sshfl [vmem:[#allocation2] sm:$0x33 pattern:$0x76325410] }
 0x338   :  { %v371_v29 = vcombine.high %v587_v28, %v587_v28  ;;  %v374_v31 = vpack.c.bf16 %v587_v28, %v587_v28 }
 0x33a   :  { %v375_v30 = vpack.c.bf16 %v371_v29, %v371_v29 }
 0x33c   :  { %540 = vmatprep.mubr.bf16.mxu0 %v375_v30 }
 0x33d   :  { %541 = vmatmul.mubr.bf16.vlgmr.msra.gmra.mrb[0].mxu0 %v374_v31 }
 0x410   :  { %v636_v32 = vpop.f32.mrb[0].mxu0 }
 0x411   :  { %v637_v34 = vpop.f32.mrb[1].mxu0 }
 0x412   :  { %v638_v35 = vadd.f32 %v637_v34, %v636_v32  ;;  %v639_v36 = vpop.f32.mrb[2].mxu0 }
 0x413   :  { %v640_v37 = vpop.f32.mrb[3].mxu0 }
 0x414   :  { %v543_v38 = vadd.f32 %v638_v35, %v588_v33 }
 0x416   :  { %v549_v39 = vmin.f32 %v543_v38, 0.0  ;;  %vm548_vm10 = vcmp.gt.f32.partialorder %v543_v38, 0.0 }
 0x418   :  { %v550_v40 = vmul.f32 1.442695, %v549_v39 }
 0x41a   :  { %708 = vpow2.f32 %v550_v40 }
 0x424   :  { %v709_v41 = vpop.eup %708 }
 0x425   :  { %v605_v42 = vadd.f32 -1.0, %v709_v41 }
 0x427   :  { %v553_v43 = vmul.f32 1.6732632, %v605_v42 }
 0x429   :  { %v554_v45 = vsel %vm548_vm10, %v543_v38, %v553_v43 }
 0x42a   :  { %v555_v46 = vmul.f32 1.050701, %v554_v45 }
 0x42c   :  { %v560_v47 = vmul.f32 %v606_v44, %v555_v46 }
 0x42e   :  { %v562_v48 = vsel %vm561_vm11, %v560_v47, 0.0 }
 0x42f   :  { %563 = vadd.xlane.f32.xlu0 %v562_v48 }
 0x4bc   :  { %v564_v50 = vpop.xlane.xlu0 %563 }
 0x4bd   :  { %v565_v51 = vadd.f32 %v564_v50, %v26_v49 }
 0x4bf   :  { %566 = vst [vmem:[%s837_s5] sm:$0x3] %v565_v51 }

</bundles_post_ra>
